<compile_context>
chip_gen: v7x
topology: tpu7x:2x2x1
jax: 0.10.0
libtpu: 0.0.40
codegen_flags: <defaults>
</compile_context>

<pallas_src>
import functools

import numpy as np
import jax
import jax.numpy as jnp
from jax.experimental import pallas as pl
from jax.experimental.pallas import tpu as pltpu

# ---------------- model dimensions (small, synthetic) ----------------
B = 2            # batch
T = 9            # raw sequence length given to the wrapper
S = T - 1        # decoder sees x[:, :-1]
D = 32           # model width
F = 64           # FFN hidden width
V = 64           # vocab size
VPAD = 128       # vocab padded to a full lane width for dense vector stores
BS = B * S       # fused row count for all matmuls
MAX_LEN = 16     # positional table length

# ---------------- packed-slab row offsets ----------------
# bf16 weight slab, shape (256, 128); all offsets are multiples of 16 (bf16 tiling).
R_EMB, R_QKV, R_WO, R_W1, R_W2, R_WOUT = 0, 64, 96, 128, 160, 224
W_ROWS = 256
# f32 slab, shape (40, 128); rows 0..7 small vectors, 8..23 pos (tiled), 24..39 attn bias.
F32_ROWS = 8 + 2 * BS


# ---------------- Pallas kernel: full decoder forward, one invocation ----------------
def _decoder_kernel(tok_ref, mask_ref, f32_ref, w_ref, out_ref):
    # ---- unpack the f32 slab (single load, value slices) ----
    f32s = f32_ref[...]                                           # (40, 128) f32
    ln1_g, ln1_b = f32s[0:1, :D], f32s[1:2, :D]
    ln2_g, ln2_b = f32s[2:3, :D], f32s[3:4, :D]
    lnf_g, lnf_b = f32s[4:5, :D], f32s[5:6, :D]
    b1 = f32s[6:7, :F]
    b2 = f32s[7:8, :D]
    pos = f32s[8:8 + BS, :D]                                      # (BS, D), pre-tiled
    attn_bias = f32s[8 + BS:8 + 2 * BS, :BS]                      # (BS, BS) static 0/-1e9

    # ---- unpack the bf16 weight slab (single load, value slices) ----
    w = w_ref[...]                                                # (256, 128) bf16
    emb_w = w[R_EMB:R_EMB + V, 0:D]                               # (V, D)
    wqkv = w[R_QKV:R_QKV + D, 0:3 * D]                            # (D, 3D)
    wo = w[R_WO:R_WO + D, 0:D]                                    # (D, D)
    w1 = w[R_W1:R_W1 + D, 0:F]                                    # (D, F)
    w2 = w[R_W2:R_W2 + F, 0:D]                                    # (F, D)
    wout = w[R_WOUT:R_WOUT + D, :]                                # (D, VPAD)

    def layernorm(v, g, b):
        mu = jnp.mean(v, axis=-1, keepdims=True)
        var = jnp.mean((v - mu) ** 2, axis=-1, keepdims=True)
        return (v - mu) * jax.lax.rsqrt(var + 1e-5) * g + b

    # ---- embedding gather (bf16 one-hot matmul, exact) + positional add ----
    tok = tok_ref[...]                                            # (BS, 1) int32
    vocab_iota = jax.lax.broadcasted_iota(jnp.int32, (BS, V), 1)
    onehot = (vocab_iota == tok).astype(jnp.bfloat16)             # (BS, V)
    emb = jnp.dot(onehot, emb_w, preferred_element_type=jnp.float32)
    x = emb + pos                                                 # (BS, D) f32 residual

    # ---- causal self-attention over all B*S rows (block-diagonal via static bias) ----
    xn = layernorm(x, ln1_g, ln1_b).astype(jnp.bfloat16)
    qkv = jnp.dot(xn, wqkv, preferred_element_type=jnp.float32)   # (BS, 3D) one MXU pass
    q = qkv[:, 0:D]
    k = qkv[:, D:2 * D]
    v = qkv[:, 2 * D:3 * D]
    scores = jax.lax.dot_general(                                 # q @ k^T, no transpose
        q.astype(jnp.bfloat16), k.astype(jnp.bfloat16),
        (((1,), (1,)), ((), ())),
        preferred_element_type=jnp.float32) * (1.0 / (D ** 0.5))  # (BS, BS)
    key_bias = (mask_ref[...] - 1.0) * 1e9                        # (1, BS): 0 or -1e9
    scores = scores + attn_bias + key_bias
    scores = scores - jnp.max(scores, axis=-1, keepdims=True)
    p = jnp.exp(scores)
    p = p * pl.reciprocal(jnp.sum(p, axis=-1, keepdims=True), approx=True)
    attn = jnp.dot(p.astype(jnp.bfloat16), v.astype(jnp.bfloat16),
                   preferred_element_type=jnp.float32)            # (BS, D)
    x = x + jnp.dot(attn.astype(jnp.bfloat16), wo,
                    preferred_element_type=jnp.float32)

    # ---- feed-forward (GELU, tanh approximation): f32 elementwise, bf16 MXU ----
    xn = layernorm(x, ln2_g, ln2_b)
    hdn = jnp.dot(xn.astype(jnp.bfloat16), w1,
                  preferred_element_type=jnp.float32) + b1
    g = 0.5 * hdn * (1.0 + jnp.tanh(0.7978845608028654 *
                                    (hdn + 0.044715 * hdn * hdn * hdn)))
    x = x + jnp.dot(g.astype(jnp.bfloat16), w2,
                    preferred_element_type=jnp.float32) + b2

    # ---- final layernorm + lane-padded vocab projection (dense 128-lane store) ----
    xn = layernorm(x, lnf_g, lnf_b)
    out_ref[...] = jnp.dot(xn.astype(jnp.bfloat16), wout,
                           preferred_element_type=jnp.float32)    # (BS, VPAD)


# ---------------- wrapper-side slab packing ----------------
def _static_attn_bias():
    r = np.arange(BS)[:, None]
    c = np.arange(BS)[None, :]
    allowed = (r // S == c // S) & (r % S >= c % S)               # same-batch & causal
    return jnp.asarray(np.where(allowed, 0.0, -1e9).astype(np.float32))


def _pack_f32_slab(params):
    slab = jnp.zeros((F32_ROWS, 128), jnp.float32)
    rows = [("ln1_g", D), ("ln1_b", D), ("ln2_g", D), ("ln2_b", D),
            ("lnf_g", D), ("lnf_b", D), ("b1", F), ("b2", D)]
    for r, (name, w) in enumerate(rows):
        slab = slab.at[r, :w].set(params[name].reshape(-1))
    pos_tiled = jnp.tile(params["pos"][:S], (B, 1))               # (BS, D)
    slab = slab.at[8:8 + BS, :D].set(pos_tiled)
    slab = slab.at[8 + BS:8 + 2 * BS, :BS].set(_static_attn_bias())
    return slab


def _pack_w_slab(params):
    slab = jnp.zeros((W_ROWS, 128), jnp.bfloat16)

    def put(s, row, arr):
        a = arr.astype(jnp.bfloat16)
        return s.at[row:row + a.shape[0], :a.shape[1]].set(a)

    slab = put(slab, R_EMB, params["embed"])                                   # (V, D)
    wqkv = jnp.concatenate([params["wq"], params["wk"], params["wv"]], axis=1)  # (D, 3D)
    slab = put(slab, R_QKV, wqkv)
    slab = put(slab, R_WO, params["wo"])
    slab = put(slab, R_W1, params["w1"])
    slab = put(slab, R_W2, params["w2"])
    slab = put(slab, R_WOUT, params["wout"])                                   # (D, V) -> lanes 0:V
    return slab


def decoder_logits(inp_tokens, pmask, params):
    """inp_tokens: (B,S) int, pmask: (B,S) -> logits (B,S,V) f32. Single fused kernel."""
    tok = inp_tokens.astype(jnp.int32).reshape(BS, 1)
    mask_flat = pmask.astype(jnp.float32).reshape(1, BS)
    f32_slab = _pack_f32_slab(params)
    w_slab = _pack_w_slab(params)

    out = pl.pallas_call(
        _decoder_kernel,
        out_shape=jax.ShapeDtypeStruct((BS, VPAD), jnp.float32),
    )(tok, mask_flat, f32_slab, w_slab)
    return out[:, :V].reshape(B, S, V)


# ---------------- glue: the AutoregressiveWrapper slicing ----------------
def autoregressive_forward(x_tokens, padding_mask, params):
    """Matches AutoregressiveWrapper.forward: returns (decoder_output, target)."""
    inp, target = x_tokens[:, :-1], x_tokens[:, 1:]
    pmask = padding_mask[:, :-1]
    logits = decoder_logits(inp, pmask, params)
    return logits, target


# ---------------- pure-JAX f32 reference (same math) for correctness ----------------
def _decoder_ref(h, mask_f, p):
    def ln(v, g, b):
        mu = jnp.mean(v, axis=-1, keepdims=True)
        var = jnp.mean((v - mu) ** 2, axis=-1, keepdims=True)
        return (v - mu) * jax.lax.rsqrt(var + 1e-5) * g + b

    x = h
    xn = ln(x, p["ln1_g"], p["ln1_b"])
    q = xn @ p["wq"]; k = xn @ p["wk"]; v = xn @ p["wv"]
    scores = jnp.einsum("bqd,bkd->bqk", q, k) * (1.0 / (D ** 0.5))
    row = jax.lax.broadcasted_iota(jnp.int32, (S, S), 0)
    col = jax.lax.broadcasted_iota(jnp.int32, (S, S), 1)
    allowed = jnp.logical_and(row >= col, mask_f > 0.5)
    scores = jnp.where(allowed, scores, -1e9)
    scores = scores - jnp.max(scores, axis=-1, keepdims=True)
    pr = jnp.exp(scores); pr = pr / jnp.sum(pr, axis=-1, keepdims=True)
    x = x + jnp.einsum("bqk,bkd->bqd", pr, v) @ p["wo"]
    xn = ln(x, p["ln2_g"], p["ln2_b"])
    hdn = xn @ p["w1"] + p["b1"]
    g = 0.5 * hdn * (1.0 + jnp.tanh(0.7978845608028654 * (hdn + 0.044715 * hdn ** 3)))
    x = x + g @ p["w2"] + p["b2"]
    xn = ln(x, p["lnf_g"], p["lnf_b"])
    return xn @ p["wout"]


# ---------------- deterministic parameter init ----------------
def init_params(key):
    ks = jax.random.split(key, 8)
    n = lambda k, shape, s: (s * jax.random.normal(k, shape, jnp.float32))
    p = {
        "embed": n(ks[0], (V, D), 0.02),
        "pos":   n(ks[1], (MAX_LEN, D), 0.02),
        "ln1_g": jnp.ones((1, D), jnp.float32), "ln1_b": jnp.zeros((1, D), jnp.float32),
        "wq": n(ks[2], (D, D), 0.05), "wk": n(ks[3], (D, D), 0.05),
        "wv": n(ks[4], (D, D), 0.05), "wo": n(ks[5], (D, D), 0.05),
        "ln2_g": jnp.ones((1, D), jnp.float32), "ln2_b": jnp.zeros((1, D), jnp.float32),
        "w1": n(ks[6], (D, F), 0.05), "b1": jnp.zeros((1, F), jnp.float32),
        "w2": n(ks[7], (F, D), 0.05), "b2": jnp.zeros((1, D), jnp.float32),
        "lnf_g": jnp.ones((1, D), jnp.float32), "lnf_b": jnp.zeros((1, D), jnp.float32),
        "wout": n(jax.random.fold_in(key, 99), (D, V), 0.05),
    }
    return p


if __name__ == "__main__":
    key = jax.random.PRNGKey(0)
    pkey, tkey = jax.random.split(key)
    params = init_params(pkey)

    x_tokens = jax.random.randint(tkey, (B, T), 0, V, dtype=jnp.int32)
    padding_mask = jnp.ones((B, T), dtype=jnp.int32).at[1, -3:].set(0)  # pad tail of row 1

    fwd = jax.jit(functools.partial(autoregressive_forward, params=params))
    logits, target = fwd(x_tokens, padding_mask)
    jax.block_until_ready((logits, target))

    # sanity: shapes and semantics of the wrapper
    assert logits.shape == (B, S, V) and target.shape == (B, S)
    assert bool(jnp.all(target == x_tokens[:, 1:]))

    # correctness vs plain-JAX f32 reference of the same decoder math
    inp = x_tokens[:, :-1]
    h = jnp.take(params["embed"], inp, axis=0) + params["pos"][:S][None, :, :]
    mask_f = padding_mask[:, :-1].astype(jnp.float32).reshape(B, 1, S)
    ref = _decoder_ref(h, mask_f, params)
    assert bool(jnp.allclose(logits, ref, atol=3e-2, rtol=3e-2)), "mismatch vs reference"

    print("KERNEL_OK")
</pallas_src>

<mosaic_0001>
module attributes {stable_mosaic.version = 11 : i64} {
  func.func @_decoder_kernel(%arg0: memref<16x1xi32, #tpu.memory_space<vmem>>, %arg1: memref<1x16xf32, #tpu.memory_space<vmem>>, %arg2: memref<40x128xf32, #tpu.memory_space<vmem>>, %arg3: memref<256x128xbf16, #tpu.memory_space<vmem>>, %arg4: memref<16x128xf32, #tpu.memory_space<vmem>>) attributes {dimension_semantics = [], scalar_prefetch = 0 : i64, scratch_operands = 0 : i64, tpu.core_type = #tpu.core_type<tc>} {
    %c0 = arith.constant 0 : index
    %c0_0 = arith.constant 0 : index
    %0 = vector.load %arg2[%c0, %c0_0] : memref<40x128xf32, #tpu.memory_space<vmem>>, vector<40x128xf32>
    %1 = vector.extract_strided_slice %0 {offsets = [0, 0], sizes = [1, 32], strides = [1, 1]} : vector<40x128xf32> to vector<1x32xf32>
    %2 = vector.extract_strided_slice %0 {offsets = [1, 0], sizes = [1, 32], strides = [1, 1]} : vector<40x128xf32> to vector<1x32xf32>
    %3 = vector.extract_strided_slice %0 {offsets = [2, 0], sizes = [1, 32], strides = [1, 1]} : vector<40x128xf32> to vector<1x32xf32>
    %4 = vector.extract_strided_slice %0 {offsets = [3, 0], sizes = [1, 32], strides = [1, 1]} : vector<40x128xf32> to vector<1x32xf32>
    %5 = vector.extract_strided_slice %0 {offsets = [4, 0], sizes = [1, 32], strides = [1, 1]} : vector<40x128xf32> to vector<1x32xf32>
    %6 = vector.extract_strided_slice %0 {offsets = [5, 0], sizes = [1, 32], strides = [1, 1]} : vector<40x128xf32> to vector<1x32xf32>
    %7 = vector.extract_strided_slice %0 {offsets = [6, 0], sizes = [1, 64], strides = [1, 1]} : vector<40x128xf32> to vector<1x64xf32>
    %8 = vector.extract_strided_slice %0 {offsets = [7, 0], sizes = [1, 32], strides = [1, 1]} : vector<40x128xf32> to vector<1x32xf32>
    %9 = vector.extract_strided_slice %0 {offsets = [8, 0], sizes = [16, 32], strides = [1, 1]} : vector<40x128xf32> to vector<16x32xf32>
    %10 = vector.extract_strided_slice %0 {offsets = [24, 0], sizes = [16, 16], strides = [1, 1]} : vector<40x128xf32> to vector<16x16xf32>
    %c0_1 = arith.constant 0 : index
    %c0_2 = arith.constant 0 : index
    %11 = vector.load %arg3[%c0_1, %c0_2] : memref<256x128xbf16, #tpu.memory_space<vmem>>, vector<256x128xbf16>
    %12 = vector.extract_strided_slice %11 {offsets = [0, 0], sizes = [64, 32], strides = [1, 1]} : vector<256x128xbf16> to vector<64x32xbf16>
    %13 = vector.extract_strided_slice %11 {offsets = [64, 0], sizes = [32, 96], strides = [1, 1]} : vector<256x128xbf16> to vector<32x96xbf16>
    %14 = vector.extract_strided_slice %11 {offsets = [96, 0], sizes = [32, 32], strides = [1, 1]} : vector<256x128xbf16> to vector<32x32xbf16>
    %15 = vector.extract_strided_slice %11 {offsets = [128, 0], sizes = [32, 64], strides = [1, 1]} : vector<256x128xbf16> to vector<32x64xbf16>
    %16 = vector.extract_strided_slice %11 {offsets = [160, 0], sizes = [64, 32], strides = [1, 1]} : vector<256x128xbf16> to vector<64x32xbf16>
    %17 = vector.extract_strided_slice %11 {offsets = [224, 0], sizes = [32, 128], strides = [1, 1]} : vector<256x128xbf16> to vector<32x128xbf16>
    %c0_3 = arith.constant 0 : index
    %c0_4 = arith.constant 0 : index
    %18 = vector.load %arg0[%c0_3, %c0_4] : memref<16x1xi32, #tpu.memory_space<vmem>>, vector<16x1xi32>
    %19 = tpu.iota {dimensions = array<i32: 1>} : vector<16x64xi32>
    %20 = vector.broadcast %18 : vector<16x1xi32> to vector<16x64xi32>
    %21 = arith.cmpi eq, %19, %20 : vector<16x64xi32>
    %22 = arith.extui %21 : vector<16x64xi1> to vector<16x64xi32>
    %23 = arith.sitofp %22 : vector<16x64xi32> to vector<16x64xf32>
    %24 = arith.truncf %23 : vector<16x64xf32> to vector<16x64xbf16>
    %cst = arith.constant dense<0.000000e+00> : vector<16x32xf32>
    %25 = tpu.matmul %24, %12, %cst {dimension_numbers = #tpu.dot_dimension_numbers<[1], [0], [0], [1], [0, 0, 1, 1], [], []>} : vector<16x64xbf16>, vector<64x32xbf16>, vector<16x32xf32> -> vector<16x32xf32>
    %26 = arith.addf %25, %9 : vector<16x32xf32>
    %cst_5 = arith.constant dense<0.000000e+00> : vector<16xf32>
    %27 = vector.multi_reduction <add>, %26, %cst_5 [1] : vector<16x32xf32> to vector<16xf32>
    %28 = vector.shape_cast %27 : vector<16xf32> to vector<16x1xf32>
    %cst_6 = arith.constant 3.200000e+01 : f32
    %29 = vector.broadcast %cst_6 : f32 to vector<16x1xf32>
    %30 = arith.divf %28, %29 : vector<16x1xf32>
    %31 = vector.broadcast %30 : vector<16x1xf32> to vector<16x32xf32>
    %32 = arith.subf %26, %31 : vector<16x32xf32>
    %33 = arith.mulf %32, %32 : vector<16x32xf32>
    %cst_7 = arith.constant dense<0.000000e+00> : vector<16xf32>
    %34 = vector.multi_reduction <add>, %33, %cst_7 [1] : vector<16x32xf32> to vector<16xf32>
    %35 = vector.shape_cast %34 : vector<16xf32> to vector<16x1xf32>
    %cst_8 = arith.constant 3.200000e+01 : f32
    %36 = vector.broadcast %cst_8 : f32 to vector<16x1xf32>
    %37 = arith.divf %35, %36 : vector<16x1xf32>
    %38 = vector.broadcast %30 : vector<16x1xf32> to vector<16x32xf32>
    %39 = arith.subf %26, %38 : vector<16x32xf32>
    %cst_9 = arith.constant 9.99999974E-6 : f32
    %40 = vector.broadcast %cst_9 : f32 to vector<16x1xf32>
    %41 = arith.addf %37, %40 : vector<16x1xf32>
    %42 = math.rsqrt %41 : vector<16x1xf32>
    %43 = vector.broadcast %42 : vector<16x1xf32> to vector<16x32xf32>
    %44 = arith.mulf %39, %43 : vector<16x32xf32>
    %45 = vector.broadcast %1 : vector<1x32xf32> to vector<16x32xf32>
    %46 = arith.mulf %44, %45 : vector<16x32xf32>
    %47 = vector.broadcast %2 : vector<1x32xf32> to vector<16x32xf32>
    %48 = arith.addf %46, %47 : vector<16x32xf32>
    %49 = arith.truncf %48 : vector<16x32xf32> to vector<16x32xbf16>
    %cst_10 = arith.constant dense<0.000000e+00> : vector<16x96xf32>
    %50 = tpu.matmul %49, %13, %cst_10 {dimension_numbers = #tpu.dot_dimension_numbers<[1], [0], [0], [1], [0, 0, 1, 1], [], []>} : vector<16x32xbf16>, vector<32x96xbf16>, vector<16x96xf32> -> vector<16x96xf32>
    %51 = vector.extract_strided_slice %50 {offsets = [0, 0], sizes = [16, 32], strides = [1, 1]} : vector<16x96xf32> to vector<16x32xf32>
    %52 = vector.extract_strided_slice %50 {offsets = [0, 32], sizes = [16, 32], strides = [1, 1]} : vector<16x96xf32> to vector<16x32xf32>
    %53 = vector.extract_strided_slice %50 {offsets = [0, 64], sizes = [16, 32], strides = [1, 1]} : vector<16x96xf32> to vector<16x32xf32>
    %54 = arith.truncf %51 : vector<16x32xf32> to vector<16x32xbf16>
    %55 = arith.truncf %52 : vector<16x32xf32> to vector<16x32xbf16>
    %cst_11 = arith.constant dense<0.000000e+00> : vector<16x16xf32>
    %56 = tpu.matmul %54, %55, %cst_11 {dimension_numbers = #tpu.dot_dimension_numbers<[1], [1], [0], [0], [0, 0, 1, 0], [], []>} : vector<16x32xbf16>, vector<16x32xbf16>, vector<16x16xf32> -> vector<16x16xf32>
    %cst_12 = arith.constant 0.176776692 : f32
    %57 = vector.broadcast %cst_12 : f32 to vector<16x16xf32>
    %58 = arith.mulf %56, %57 : vector<16x16xf32>
    %c0_13 = arith.constant 0 : index
    %c0_14 = arith.constant 0 : index
    %59 = vector.load %arg1[%c0_13, %c0_14] : memref<1x16xf32, #tpu.memory_space<vmem>>, vector<1x16xf32>
    %cst_15 = arith.constant 1.000000e+00 : f32
    %60 = vector.broadcast %cst_15 : f32 to vector<1x16xf32>
    %61 = arith.subf %59, %60 : vector<1x16xf32>
    %cst_16 = arith.constant 1.000000e+09 : f32
    %62 = vector.broadcast %cst_16 : f32 to vector<1x16xf32>
    %63 = arith.mulf %61, %62 : vector<1x16xf32>
    %64 = arith.addf %58, %10 : vector<16x16xf32>
    %65 = vector.broadcast %63 : vector<1x16xf32> to vector<16x16xf32>
    %66 = arith.addf %64, %65 : vector<16x16xf32>
    %cst_17 = arith.constant dense<0xFF800000> : vector<16xf32>
    %67 = vector.multi_reduction <maximumf>, %66, %cst_17 [1] : vector<16x16xf32> to vector<16xf32>
    %68 = vector.shape_cast %67 : vector<16xf32> to vector<16x1xf32>
    %69 = vector.broadcast %68 : vector<16x1xf32> to vector<16x16xf32>
    %70 = arith.subf %66, %69 : vector<16x16xf32>
    %71 = math.exp %70 : vector<16x16xf32>
    %cst_18 = arith.constant dense<0.000000e+00> : vector<16xf32>
    %72 = vector.multi_reduction <add>, %71, %cst_18 [1] : vector<16x16xf32> to vector<16xf32>
    %73 = vector.shape_cast %72 : vector<16xf32> to vector<16x1xf32>
    %74 = tpu.reciprocal %73 {approx = true} : vector<16x1xf32> -> vector<16x1xf32>
    %75 = vector.broadcast %74 : vector<16x1xf32> to vector<16x16xf32>
    %76 = arith.mulf %71, %75 : vector<16x16xf32>
    %77 = arith.truncf %76 : vector<16x16xf32> to vector<16x16xbf16>
    %78 = arith.truncf %53 : vector<16x32xf32> to vector<16x32xbf16>
    %cst_19 = arith.constant dense<0.000000e+00> : vector<16x32xf32>
    %79 = tpu.matmul %77, %78, %cst_19 {dimension_numbers = #tpu.dot_dimension_numbers<[1], [0], [0], [1], [0, 0, 1, 1], [], []>} : vector<16x16xbf16>, vector<16x32xbf16>, vector<16x32xf32> -> vector<16x32xf32>
    %80 = arith.truncf %79 : vector<16x32xf32> to vector<16x32xbf16>
    %cst_20 = arith.constant dense<0.000000e+00> : vector<16x32xf32>
    %81 = tpu.matmul %80, %14, %cst_20 {dimension_numbers = #tpu.dot_dimension_numbers<[1], [0], [0], [1], [0, 0, 1, 1], [], []>} : vector<16x32xbf16>, vector<32x32xbf16>, vector<16x32xf32> -> vector<16x32xf32>
    %82 = arith.addf %26, %81 : vector<16x32xf32>
    %cst_21 = arith.constant dense<0.000000e+00> : vector<16xf32>
    %83 = vector.multi_reduction <add>, %82, %cst_21 [1] : vector<16x32xf32> to vector<16xf32>
    %84 = vector.shape_cast %83 : vector<16xf32> to vector<16x1xf32>
    %cst_22 = arith.constant 3.200000e+01 : f32
    %85 = vector.broadcast %cst_22 : f32 to vector<16x1xf32>
    %86 = arith.divf %84, %85 : vector<16x1xf32>
    %87 = vector.broadcast %86 : vector<16x1xf32> to vector<16x32xf32>
    %88 = arith.subf %82, %87 : vector<16x32xf32>
    %89 = arith.mulf %88, %88 : vector<16x32xf32>
    %cst_23 = arith.constant dense<0.000000e+00> : vector<16xf32>
    %90 = vector.multi_reduction <add>, %89, %cst_23 [1] : vector<16x32xf32> to vector<16xf32>
    %91 = vector.shape_cast %90 : vector<16xf32> to vector<16x1xf32>
    %cst_24 = arith.constant 3.200000e+01 : f32
    %92 = vector.broadcast %cst_24 : f32 to vector<16x1xf32>
    %93 = arith.divf %91, %92 : vector<16x1xf32>
    %94 = vector.broadcast %86 : vector<16x1xf32> to vector<16x32xf32>
    %95 = arith.subf %82, %94 : vector<16x32xf32>
    %cst_25 = arith.constant 9.99999974E-6 : f32
    %96 = vector.broadcast %cst_25 : f32 to vector<16x1xf32>
    %97 = arith.addf %93, %96 : vector<16x1xf32>
    %98 = math.rsqrt %97 : vector<16x1xf32>
    %99 = vector.broadcast %98 : vector<16x1xf32> to vector<16x32xf32>
    %100 = arith.mulf %95, %99 : vector<16x32xf32>
    %101 = vector.broadcast %3 : vector<1x32xf32> to vector<16x32xf32>
    %102 = arith.mulf %100, %101 : vector<16x32xf32>
    %103 = vector.broadcast %4 : vector<1x32xf32> to vector<16x32xf32>
    %104 = arith.addf %102, %103 : vector<16x32xf32>
    %105 = arith.truncf %104 : vector<16x32xf32> to vector<16x32xbf16>
    %cst_26 = arith.constant dense<0.000000e+00> : vector<16x64xf32>
    %106 = tpu.matmul %105, %15, %cst_26 {dimension_numbers = #tpu.dot_dimension_numbers<[1], [0], [0], [1], [0, 0, 1, 1], [], []>} : vector<16x32xbf16>, vector<32x64xbf16>, vector<16x64xf32> -> vector<16x64xf32>
    %107 = vector.broadcast %7 : vector<1x64xf32> to vector<16x64xf32>
    %108 = arith.addf %106, %107 : vector<16x64xf32>
    %cst_27 = arith.constant 5.000000e-01 : f32
    %109 = vector.broadcast %cst_27 : f32 to vector<16x64xf32>
    %110 = arith.mulf %109, %108 : vector<16x64xf32>
    %cst_28 = arith.constant 4.471500e-02 : f32
    %111 = vector.broadcast %cst_28 : f32 to vector<16x64xf32>
    %112 = arith.mulf %111, %108 : vector<16x64xf32>
    %113 = arith.mulf %112, %108 : vector<16x64xf32>
    %114 = arith.mulf %113, %108 : vector<16x64xf32>
    %115 = arith.addf %108, %114 : vector<16x64xf32>
    %cst_29 = arith.constant 0.797884583 : f32
    %116 = vector.broadcast %cst_29 : f32 to vector<16x64xf32>
    %117 = arith.mulf %116, %115 : vector<16x64xf32>
    %118 = math.tanh %117 : vector<16x64xf32>
    %cst_30 = arith.constant 1.000000e+00 : f32
    %119 = vector.broadcast %cst_30 : f32 to vector<16x64xf32>
    %120 = arith.addf %119, %118 : vector<16x64xf32>
    %121 = arith.mulf %110, %120 : vector<16x64xf32>
    %122 = arith.truncf %121 : vector<16x64xf32> to vector<16x64xbf16>
    %cst_31 = arith.constant dense<0.000000e+00> : vector<16x32xf32>
    %123 = tpu.matmul %122, %16, %cst_31 {dimension_numbers = #tpu.dot_dimension_numbers<[1], [0], [0], [1], [0, 0, 1, 1], [], []>} : vector<16x64xbf16>, vector<64x32xbf16>, vector<16x32xf32> -> vector<16x32xf32>
    %124 = arith.addf %82, %123 : vector<16x32xf32>
    %125 = vector.broadcast %8 : vector<1x32xf32> to vector<16x32xf32>
    %126 = arith.addf %124, %125 : vector<16x32xf32>
    %cst_32 = arith.constant dense<0.000000e+00> : vector<16xf32>
    %127 = vector.multi_reduction <add>, %126, %cst_32 [1] : vector<16x32xf32> to vector<16xf32>
    %128 = vector.shape_cast %127 : vector<16xf32> to vector<16x1xf32>
    %cst_33 = arith.constant 3.200000e+01 : f32
    %129 = vector.broadcast %cst_33 : f32 to vector<16x1xf32>
    %130 = arith.divf %128, %129 : vector<16x1xf32>
    %131 = vector.broadcast %130 : vector<16x1xf32> to vector<16x32xf32>
    %132 = arith.subf %126, %131 : vector<16x32xf32>
    %133 = arith.mulf %132, %132 : vector<16x32xf32>
    %cst_34 = arith.constant dense<0.000000e+00> : vector<16xf32>
    %134 = vector.multi_reduction <add>, %133, %cst_34 [1] : vector<16x32xf32> to vector<16xf32>
    %135 = vector.shape_cast %134 : vector<16xf32> to vector<16x1xf32>
    %cst_35 = arith.constant 3.200000e+01 : f32
    %136 = vector.broadcast %cst_35 : f32 to vector<16x1xf32>
    %137 = arith.divf %135, %136 : vector<16x1xf32>
    %138 = vector.broadcast %130 : vector<16x1xf32> to vector<16x32xf32>
    %139 = arith.subf %126, %138 : vector<16x32xf32>
    %cst_36 = arith.constant 9.99999974E-6 : f32
    %140 = vector.broadcast %cst_36 : f32 to vector<16x1xf32>
    %141 = arith.addf %137, %140 : vector<16x1xf32>
    %142 = math.rsqrt %141 : vector<16x1xf32>
    %143 = vector.broadcast %142 : vector<16x1xf32> to vector<16x32xf32>
    %144 = arith.mulf %139, %143 : vector<16x32xf32>
    %145 = vector.broadcast %5 : vector<1x32xf32> to vector<16x32xf32>
    %146 = arith.mulf %144, %145 : vector<16x32xf32>
    %147 = vector.broadcast %6 : vector<1x32xf32> to vector<16x32xf32>
    %148 = arith.addf %146, %147 : vector<16x32xf32>
    %149 = arith.truncf %148 : vector<16x32xf32> to vector<16x32xbf16>
    %cst_37 = arith.constant dense<0.000000e+00> : vector<16x128xf32>
    %150 = tpu.matmul %149, %17, %cst_37 {dimension_numbers = #tpu.dot_dimension_numbers<[1], [0], [0], [1], [0, 0, 1, 1], [], []>} : vector<16x32xbf16>, vector<32x128xbf16>, vector<16x128xf32> -> vector<16x128xf32>
    %c0_38 = arith.constant 0 : index
    %c0_39 = arith.constant 0 : index
    %151 = vector.load %arg4[%c0_38, %c0_39] : memref<16x128xf32, #tpu.memory_space<vmem>>, vector<16x128xf32>
    tpu.vector_store %arg4[%c0_38, %c0_39], %150 {strides = array<i32>} : memref<16x128xf32, #tpu.memory_space<vmem>>, vector<16x128xf32>,
    return
  }
}

</mosaic_0001>

<bundles_post_ra>
// kernel: autoregressive_forward.1
= control target key start
LH: loop header
LB: loop body
LE: loop exit
PB: predicated region body
PF: predicated region fallthrough
CT: control target
= control target key end

     0   :  { %v896_v0 = vmov 0   ;;  %v897_v2 = vmov 0.0   ;;  %vm898_vm0 = vmmov 0   ;;  %v57_v8 = vlaneseq  ;;  %s899_s10 = smov 96   ;;  %s1105_s0 = inlined_call_operand.vmem [shape: s32[16,1], index: 0, kind: input, shape index: {}]   ;;  %s1106_s3 = inlined_call_operand.vmem [shape: bf16[256,128], index: 3, kind: input, shape index: {}]   ;;  %s1107_s2 = inlined_call_operand.vmem [shape: f32[40,128], index: 2, kind: input, shape index: {}]   ;;  %s1108_s1 = inlined_call_operand.vmem [shape: f32[1,16], index: 1, kind: input, shape index: {}]   ;;  %s1109_s4 = inlined_call_operand.vmem [shape: f32[16,128], index: 4, kind: output, shape index: {}]  }
   0x1   :  { %855 = vset.pattern.permute.xlu0 %v896_v0  ;;  %v55_v1 = vld [vmem:[%s1105_s0] sm:$0xff]  ;;  %782 = vmatprep.subr.bf16.mxu0 %v897_v2  ;;  %v56_v4 = vld [vmem:[%s1105_s0 + $0x8] sm:$0xff]  ;;  %v858_v6 = vld [vmem:[%s1106_s3 + $0x10] sm:$0xff]   ;;  %vm96_vm3 = vcmask 523264   ;;  %vm141_vm4 = vcmask 261120   ;;  %vm304_vm5 = vcmask 130048  }
   0x2   :  { %60 = vperm.xlu0 %855, %v55_v1   ;;  %v856_v3 = vld [vmem:[%s1106_s3] sm:$0xff]   ;;  %794 = vmatprep.subr.bf16.mxu1 %v897_v2  ;;  %v857_v5 = vld [vmem:[%s1106_s3 + $0x8] sm:$0xff]   ;;  %v859_v7 = vld [vmem:[%s1106_s3 + $0x18] sm:$0xff]   ;;  %v58_v9 = vand.u32 127, %v57_v8  ;;  %v985_v43 = vshrl.u32 %v57_v8, 7 }
   0x3   :  { %783 = vmatpush3.bf16.msra.mxu0 %v856_v3  ;;  %790 = vmatprep.mubr.msk.bf16.mxu0 %vm898_vm0, %v897_v2  ;;  %v19_v15 = vld [vmem:[%s1107_s2 + $0x8] sm:$0xff]  ;;  %v20_v17 = vld [vmem:[%s1107_s2 + $0x10] sm:$0xff]  ;;  %v860_v35 = vld [vmem:[%s1106_s3 + $0x20] sm:$0xff]  }
   0x4   :  { %784 = vmatprep.subr.bf16.mxu0 %v897_v2  ;;  %798 = vmatprep.mubr.msk.bf16.mxu1 %vm898_vm0, %v897_v2  ;;  %v861_v36 = vld [vmem:[%s1106_s3 + $0x28] sm:$0xff]   ;;  %v171_v44 = vsub.s32 0, %v985_v43  ;;  %v991_v45 = vld [vmem:[%s1107_s2] sm:$0xff]  ;;  %v177_v49 = vsub.s32 1, %v985_v43 }
   0x5   :  { %795 = vmatpush3.bf16.msra.mxu1 %v860_v35  ;;  %v291_v1 = vld [vmem:[%s1108_s1] sm:$0x1]  ;;  %s900_s1 = smov 64  }
   0x6   :  { %63 = vperm.xlu0 %855, %v56_v4   ;;  %796 = vmatprep.subr.bf16.mxu1 %v897_v2  ;;  %v172_v48 = vrot.slane %v991_v45, %v171_v44  ;;  %v178_v53 = vrot.slane %v991_v45, %v177_v49  ;;  %v740_v3 = vadd.f32 -1.0, %v291_v1  ;;  %v864_v1 = vld [vmem:[%s1106_s3 + $0x40] sm:$0xff]  }
   0x7   :  { %785 = vmatpush3.bf16.msra.mxu0 %v857_v5  ;;  %v21_v5 = vld [vmem:[%s1107_s2 + $0x18] sm:$0xff] }
   0x8   :  { %786 = vmatprep.subr.bf16.mxu0 %v897_v2  ;;  %v293_v4 = vmul.f32 1e+09, %v740_v3  ;;  %v865_v3 = vld [vmem:[%s1106_s3 + $0x48] sm:$0xff]  }
   0x9   :  { %797 = vmatpush3.bf16.msra.mxu1 %v861_v36 }
   0xa   :  { %802 = vmatprep.subr.bf16.mxu1 %v897_v2 }
   0xb   :  { %787 = vmatpush3.bf16.msra.mxu0 %v858_v6 }
   0xc   :  { %788 = vmatprep.subr.bf16.mxu0 %v897_v2 }
   0xf   :  { %789 = vmatpush3.bf16.msra.mxu0 %v859_v7 }
  0x10   :  { %808 = vmatprep.subr.bf16.mxu0 %v897_v2 }
  0x81   :  { %v61_v10 = vpop.permute.xlu0 %60 }
  0x82   :  { %vm65_vm1 = vcmp.eq.s32.totalorder %v58_v9, %v61_v10  ;;  %v22_v10 = vld [vmem:[%s1107_s2 + $0x20] sm:$0xff] }
  0x83   :  { %v729_v12 = vsel %vm65_vm1, 1.0, %v897_v2 }
  0x85   :  { %v64_v11 = vpop.permute.xlu0 %63 }
  0x86   :  { %vm66_vm2 = vcmp.eq.s32.totalorder %v58_v9, %v64_v11  ;;  %v300_v9 = vrot.slane %v293_v4, %v171_v44 }
  0x87   :  { %v730_v13 = vsel %vm66_vm2, 1.0, %v897_v2 }
  0x88   :  { %v71_v14 = vpack.c.bf16 %v730_v13, %v729_v12 }
  0x8a   :  { %791 = vmatmul.mubr.msk.bf16.vlgmr.msra.gmra.mrb[0].mxu0 %vm96_vm3, %v71_v14 }
  0x8b   :  { %810 = vmatprep.mubr.msk.bf16.mxu0 %vm898_vm0, %v897_v2 }
 0x15d   :  { %v134_v16 = vpop.f32.mrb[0].mxu0 }
 0x15e   :  { %v965_v18 = vadd.f32 %v134_v16, %v19_v15  ;;  %v792_v19 = vpop.f32.mrb[1].mxu0 }
 0x15f   :  { %v137_v20 = vpop.f32.mrb[2].mxu0 }
 0x160   :  { %v967_v21 = vadd.f32 %v137_v20, %v20_v17  ;;  %v793_v22 = vpop.f32.mrb[3].mxu0  ;;  %v142_v23 = vsel %vm141_vm4, %v965_v18, 0.0 }
 0x161   :  { %143 = vadd.xlane.f32.xlu1 %v142_v23 }
 0x162   :  { %v145_v24 = vsel %vm141_vm4, %v967_v21, 0.0 }
 0x165   :  { %146 = vadd.xlane.f32.xlu1 %v145_v24 }
 0x1ee   :  { %v144_v25 = vpop.xlane.xlu1 %143 }
 0x1ef   :  { %v149_v26 = vmul.f32 0.03125, %v144_v25 }
 0x1f1   :  { %v151_v27 = vsub.f32 %v965_v18, %v149_v26 }
 0x1f2   :  { %v147_v28 = vpop.xlane.xlu1 %146 }
 0x1f3   :  { %v150_v29 = vmul.f32 0.03125, %v147_v28  ;;  %v153_v30 = vmul.f32 %v151_v27, %v151_v27 }
 0x1f5   :  { %v152_v31 = vsub.f32 %v967_v21, %v150_v29  ;;  %v155_v32 = vsel %vm141_vm4, %v153_v30, 0.0 }
 0x1f6   :  { %156 = vadd.xlane.f32.xlu0 %v155_v32  ;;  %v862_v32 = vld [vmem:[%s1106_s3 + $0x30] sm:$0xff]  }
 0x1f7   :  { %v154_v33 = vmul.f32 %v152_v31, %v152_v31 }
 0x1f9   :  { %v158_v34 = vsel %vm141_vm4, %v154_v33, 0.0 }
 0x1fa   :  { %159 = vadd.xlane.f32.xlu1 %v158_v34 }
 0x283   :  { %v157_v37 = vpop.xlane.xlu0 %156 }
 0x284   :  { %v161_v38 = vmul.f32 0.03125, %v157_v37 }
 0x286   :  { %v163_v39 = vadd.f32 1e-05, %v161_v38 }
 0x287   :  { %v160_v40 = vpop.xlane.xlu1 %159 }
 0x288   :  { %872 = vrsqrt.f32 %v163_v39  ;;  %v162_v41 = vmul.f32 0.03125, %v160_v40 }
 0x28a   :  { %v164_v42 = vadd.f32 1e-05, %v162_v41  ;;  %v863_v41 = vld [vmem:[%s1106_s3 + $0x38] sm:$0xff]  }
 0x28c   :  { %874 = vrsqrt.f32 %v164_v42 }
 0x292   :  { %v873_v46 = vpop.eup %872 }
 0x293   :  { %v167_v47 = vmul.f32 %v873_v46, %v151_v27 }
 0x295   :  { %v173_v52 = vmul.f32 %v172_v48, %v167_v47 }
 0x296   :  { %v875_v50 = vpop.eup %874 }
 0x297   :  { %v168_v51 = vmul.f32 %v875_v50, %v152_v31  ;;  %v179_v55 = vadd.f32 %v178_v53, %v173_v52 }
 0x299   :  { %v174_v54 = vmul.f32 %v172_v48, %v168_v51 }
 0x29b   :  { %v180_v56 = vadd.f32 %v178_v53, %v174_v54 }
 0x29d   :  { %v181_v57 = vpack.c.bf16 %v180_v56, %v179_v55 }
 0x29f   :  { %799 = vmatmul.mubr.msk.bf16.vlgmr.msra.gmra.mrb[0].mxu1 %vm141_vm4, %v181_v57 }
 0x2a0   :  { %804 = vmatprep.mubr.msk.bf16.mxu1 %vm898_vm0, %v897_v2 }
 0x372   :  { %v231_v58 = vpop.f32.mrb[0].mxu1 }
 0x373   :  { %v800_v59 = vpop.f32.mrb[1].mxu1 }
 0x374   :  { %v234_v60 = vpop.f32.mrb[2].mxu1 }
 0x375   :  { %v238_v61 = vpack.c.bf16 %v234_v60, %v231_v58  ;;  %v801_v62 = vpop.f32.mrb[3].mxu1 }
 0x377   :  { %240 = vrot.lane.b32.xlu1 %v238_v61, %s899_s10 }
 0x3e9   :  { %v241_v63 = vpop.permute.xlu1 %240 }
 0x3ea   :  { %v246_v0 = vsel %vm141_vm4, %v241_v63, 0 }
 0x3eb   :  { %803 = vmatpush3.bf16.xpose.msra.mxu1 %v246_v0 }
 0x3ec   :  { %814 = vmatprep.subr.bf16.mxu1 %v897_v2 }
 0x3f2   :  { %805 = vmatmul.mubr.msk.bf16.vlgmr.msra.gmra.mrb[4].mxu1 %vm141_vm4, %v238_v61 }
 0x3f3   :  { %818 = vmatprep.mubr.msk.bf16.mxu1 %vm898_vm0, %v897_v2  ;;  %815 = vmatpush3.bf16.msra.mxu1 %v862_v32 }
 0x3f4   :  { %816 = vmatprep.subr.bf16.mxu1 %v897_v2 }
 0x3f7   :  { %817 = vmatpush3.bf16.msra.mxu1 %v863_v41 }
 0x3f8   :  { %830 = vmatprep.subr.bf16.mxu1 %v897_v2 }
 0x4c5   :  { %v282_v6 = vpop.f32.mrb[4].mxu1 }
 0x4c6   :  { %v289_v7 = vmul.f32 0.17677669, %v282_v6  ;;  %v806_v8 = vpop.f32.mrb[5].mxu1 }
 0x4c7   :  { %v285_v11 = vpop.f32.mrb[6].mxu1 }
 0x4c8   :  { %v294_v12 = vadd.f32 %v289_v7, %v21_v5  ;;  %v290_v13 = vmul.f32 0.17677669, %v285_v11  ;;  %v807_v14 = vpop.f32.mrb[7].mxu1 }
 0x4c9   :  { %v468_v14 = vsub.s32 3, %v985_v43 }
 0x4ca   :  { %v295_v15 = vadd.f32 %v290_v13, %v22_v10  ;;  %v302_v16 = vadd.f32 %v300_v9, %v294_v12  ;;  %v462_v10 = vsub.s32 2, %v985_v43 }
 0x4cc   :  { %v305_v17 = vsel %vm304_vm5, %v302_v16, -inf  ;;  %v303_v19 = vadd.f32 %v300_v9, %v295_v15  ;;  %v463_v12 = vrot.slane %v991_v45, %v462_v10 }
 0x4cd   :  { %306 = vmax.xlane.f32.xlu1 %v305_v17 }
 0x4ce   :  { %v308_v20 = vsel %vm304_vm5, %v303_v19, -inf }
 0x4cf   :  { %309 = vmax.xlane.f32.xlu0 %v308_v20 }
 0x55a   :  { %v307_v22 = vpop.xlane.xlu1 %306 }
 0x55b   :  { %v311_v23 = vsub.f32 %v302_v16, %v307_v22 }
 0x55c   :  { %v310_v24 = vpop.xlane.xlu0 %309 }
 0x55d   :  { %v313_v25 = vmul.f32 1.442695, %v311_v23  ;;  %v312_v26 = vsub.f32 %v303_v19, %v310_v24  ;;  %v469_v19 = vrot.slane %v991_v45, %v468_v14 }
 0x55f   :  { %876 = vpow2.f32 %v313_v25  ;;  %v315_v27 = vmul.f32 1.442695, %v312_v26  ;;  %v866_v25 = vld [vmem:[%s1106_s3 + $0x50] sm:$0xff]   ;;  %v867_v26 = vld [vmem:[%s1106_s3 + $0x58] sm:$0xff]  }
 0x561   :  { %878 = vpow2.f32 %v315_v27  ;;  %v868_v27 = vld [vmem:[%s1106_s3 + $0x60] sm:$0xff]  }
 0x569   :  { %v877_v28 = vpop.eup %876 }
 0x56a   :  { %v317_v29 = vsel %vm304_vm5, %v877_v28, 0.0 }
 0x56b   :  { %v879_v30 = vpop.eup %878  ;;  %318 = vadd.xlane.f32.xlu0 %v317_v29  ;;  %v475_v29 = vsub.s32 6, %v985_v43 }
 0x56c   :  { %v320_v31 = vsel %vm304_vm5, %v879_v30, 0.0 }
 0x56f   :  { %321 = vadd.xlane.f32.xlu0 %v320_v31 }
 0x585   :  { %328 = vrot.lane.b32.xlu0 %v238_v61, %s900_s1 }
 0x5f8   :  { %v319_v33 = vpop.xlane.xlu0 %318 }
 0x5f9   :  { %880 = vrcp.f32 %v319_v33 }
 0x5fc   :  { %v322_v34 = vpop.xlane.xlu0 %321 }
 0x5fd   :  { %882 = vrcp.f32 %v322_v34 }
 0x600   :  { %v329_v35 = vpop.permute.xlu0 %328 }
 0x601   :  { %809 = vmatpush3.bf16.msra.mxu0 %v329_v35 }
 0x602   :  { %822 = vmatprep.subr.bf16.mxu0 %v897_v2 }
 0x603   :  { %v881_v36 = vpop.eup %880 }
 0x604   :  { %v325_v38 = vmul.f32 %v881_v36, %v877_v28  ;;  %v869_v28 = vld [vmem:[%s1106_s3 + $0x68] sm:$0xff]  }
 0x607   :  { %v883_v37 = vpop.eup %882 }
 0x608   :  { %v326_v39 = vmul.f32 %v883_v37, %v879_v30  ;;  %v476_v30 = vrot.slane %v991_v45, %v475_v29 }
 0x60a   :  { %v327_v40 = vpack.c.bf16 %v326_v39, %v325_v38 }
 0x60c   :  { %811 = vmatmul.mubr.msk.bf16.vlgmr.msra.gmra.mrb[4].mxu0 %vm304_vm5, %v327_v40 }
 0x60d   :  { %826 = vmatprep.mubr.msk.bf16.mxu0 %vm898_vm0, %v897_v2  ;;  %823 = vmatpush3.bf16.msra.mxu0 %v864_v1 }
 0x60e   :  { %824 = vmatprep.subr.bf16.mxu0 %v897_v2 }
 0x611   :  { %825 = vmatpush3.bf16.msra.mxu0 %v865_v3 }
 0x612   :  { %842 = vmatprep.subr.bf16.mxu0 %v897_v2 }
 0x6df   :  { %v368_v42 = vpop.f32.mrb[4].mxu0 }
 0x6e0   :  { %v812_v44 = vpop.f32.mrb[5].mxu0 }
 0x6e1   :  { %v371_v46 = vpop.f32.mrb[6].mxu0 }
 0x6e2   :  { %v375_v47 = vpack.c.bf16 %v371_v46, %v368_v42  ;;  %v813_v48 = vpop.f32.mrb[7].mxu0 }
 0x6e4   :  { %819 = vmatmul.mubr.msk.bf16.vlgmr.msra.gmra.mrb[8].mxu1 %vm141_vm4, %v375_v47 }
 0x6e5   :  { %838 = vmatprep.mubr.msk.bf16.mxu1 %vm898_vm0, %v897_v2  ;;  %831 = vmatpush3.bf16.msra.mxu1 %v866_v25  ;;  %v656_v25 = vsub.s32 4, %v985_v43 }
 0x6e6   :  { %832 = vmatprep.subr.bf16.mxu1 %v897_v2 }
 0x6e9   :  { %833 = vmatpush3.bf16.msra.mxu1 %v867_v26 }
 0x6ea   :  { %834 = vmatprep.subr.bf16.mxu1 %v897_v2 }
 0x6ed   :  { %835 = vmatpush3.bf16.msra.mxu1 %v868_v27  ;;  %v657_v27 = vrot.slane %v991_v45, %v656_v25 }
 0x6ee   :  { %836 = vmatprep.subr.bf16.mxu1 %v897_v2 }
 0x6f1   :  { %837 = vmatpush3.bf16.msra.mxu1 %v869_v28 }
 0x7b7   :  { %v425_v49 = vpop.f32.mrb[8].mxu1 }
 0x7b8   :  { %v1033_v50 = vadd.f32 %v425_v49, %v965_v18  ;;  %v820_v51 = vpop.f32.mrb[9].mxu1 }
 0x7b9   :  { %v428_v52 = vpop.f32.mrb[10].mxu1 }
 0x7ba   :  { %v1036_v53 = vadd.f32 %v428_v52, %v967_v21  ;;  %v821_v54 = vpop.f32.mrb[11].mxu1  ;;  %v434_v55 = vsel %vm141_vm4, %v1033_v50, 0.0 }
 0x7bb   :  { %435 = vadd.xlane.f32.xlu1 %v434_v55 }
 0x7bc   :  { %v437_v56 = vsel %vm141_vm4, %v1036_v53, 0.0 }
 0x7bf   :  { %438 = vadd.xlane.f32.xlu1 %v437_v56 }
 0x848   :  { %v436_v57 = vpop.xlane.xlu1 %435 }
 0x849   :  { %v440_v58 = vmul.f32 0.03125, %v436_v57 }
 0x84b   :  { %v442_v59 = vsub.f32 %v1033_v50, %v440_v58 }
 0x84c   :  { %v439_v18 = vpop.xlane.xlu1 %438 }
 0x84d   :  { %v441_v60 = vmul.f32 0.03125, %v439_v18  ;;  %v444_v61 = vmul.f32 %v442_v59, %v442_v59  ;;  %v624_v18 = vsub.s32 7, %v985_v43 }
 0x84f   :  { %v443_v62 = vsub.f32 %v1036_v53, %v441_v60  ;;  %v446_v21 = vsel %vm141_vm4, %v444_v61, 0.0  ;;  %v625_v60 = vrot.slane %v991_v45, %v624_v18 }
 0x850   :  { %447 = vadd.xlane.f32.xlu0 %v446_v21 }
 0x851   :  { %v445_v63 = vmul.f32 %v443_v62, %v443_v62 }
 0x853   :  { %v449_v0 = vsel %vm141_vm4, %v445_v63, 0.0 }
 0x854   :  { %450 = vadd.xlane.f32.xlu1 %v449_v0 }
 0x8dd   :  { %v448_v4 = vpop.xlane.xlu0 %447 }
 0x8de   :  { %v452_v5 = vmul.f32 0.03125, %v448_v4 }
 0x8e0   :  { %v454_v6 = vadd.f32 1e-05, %v452_v5 }
 0x8e1   :  { %v451_v7 = vpop.xlane.xlu1 %450 }
 0x8e2   :  { %884 = vrsqrt.f32 %v454_v6  ;;  %v453_v8 = vmul.f32 0.03125, %v451_v7 }
 0x8e4   :  { %v455_v9 = vadd.f32 1e-05, %v453_v8 }
 0x8e6   :  { %886 = vrsqrt.f32 %v455_v9 }
 0x8ec   :  { %v885_v11 = vpop.eup %884 }
 0x8ed   :  { %v458_v13 = vmul.f32 %v885_v11, %v442_v59 }
 0x8ef   :  { %v464_v16 = vmul.f32 %v463_v12, %v458_v13 }
 0x8f0   :  { %v887_v15 = vpop.eup %886 }
 0x8f1   :  { %v459_v17 = vmul.f32 %v887_v15, %v443_v62  ;;  %v470_v22 = vadd.f32 %v469_v19, %v464_v16  ;;  %v870_v15 = vld [vmem:[%s1106_s3 + $0x70] sm:$0xff]   ;;  %v871_v16 = vld [vmem:[%s1106_s3 + $0x78] sm:$0xff]  }
 0x8f3   :  { %v465_v20 = vmul.f32 %v463_v12, %v459_v17 }
 0x8f5   :  { %v471_v23 = vadd.f32 %v469_v19, %v465_v20 }
 0x8f7   :  { %v472_v24 = vpack.c.bf16 %v471_v23, %v470_v22 }
 0x8f9   :  { %827 = vmatmul.mubr.msk.bf16.vlgmr.msra.gmra.mrb[8].mxu0 %vm141_vm4, %v472_v24 }
 0x8fa   :  { %846 = vmatprep.mubr.msk.bf16.mxu0 %vm898_vm0, %v897_v2  ;;  %843 = vmatpush3.bf16.msra.mxu0 %v870_v15 }
 0x8fb   :  { %844 = vmatprep.subr.bf16.mxu0 %v897_v2  ;;  %v662_v2 = vsub.s32 5, %v985_v43 }
 0x8fe   :  { %845 = vmatpush3.bf16.msra.mxu0 %v871_v16 }
 0x9cc   :  { %v526_v31 = vpop.f32.mrb[8].mxu0 }
 0x9cd   :  { %v527_v32 = vadd.f32 %v526_v31, %v476_v30  ;;  %v828_v33 = vpop.f32.mrb[9].mxu0 }
 0x9ce   :  { %v529_v34 = vpop.f32.mrb[10].mxu0 }
 0x9cf   :  { %v535_v35 = vmul.f32 0.044715, %v527_v32  ;;  %v530_v36 = vadd.f32 %v529_v34, %v476_v30  ;;  %v829_v37 = vpop.f32.mrb[11].mxu0  ;;  %v533_v54 = vmul.f32 0.5, %v527_v32 }
 0x9d1   :  { %v537_v38 = vmul.f32 %v535_v35, %v527_v32  ;;  %v536_v39 = vmul.f32 0.044715, %v530_v36  ;;  %v534_v55 = vmul.f32 0.5, %v530_v36 }
 0x9d3   :  { %v539_v40 = vmul.f32 %v537_v38, %v527_v32  ;;  %v538_v41 = vmul.f32 %v536_v39, %v530_v36 }
 0x9d5   :  { %v541_v42 = vadd.f32 %v539_v40, %v527_v32  ;;  %v540_v44 = vmul.f32 %v538_v41, %v530_v36  ;;  %v663_v32 = vrot.slane %v991_v45, %v662_v2 }
 0x9d7   :  { %v543_v46 = vmul.f32 0.7978846, %v541_v42  ;;  %v542_v47 = vadd.f32 %v540_v44, %v530_v36 }
 0x9d9   :  { %888 = vtanh.f32 %v543_v46  ;;  %v544_v48 = vmul.f32 0.7978846, %v542_v47 }
 0x9db   :  { %890 = vtanh.f32 %v544_v48 }
 0x9e3   :  { %v889_v49 = vpop.eup %888 }
 0x9e4   :  { %v547_v51 = vadd.f32 1.0, %v889_v49 }
 0x9e5   :  { %v891_v52 = vpop.eup %890 }
 0x9e6   :  { %v548_v56 = vadd.f32 1.0, %v891_v52  ;;  %v549_v57 = vmul.f32 %v547_v51, %v533_v54 }
 0x9e8   :  { %v550_v58 = vmul.f32 %v548_v56, %v534_v55 }
 0x9ea   :  { %v551_v59 = vpack.c.bf16 %v550_v58, %v549_v57 }
 0x9ec   :  { %839 = vmatmul.mubr.msk.bf16.vlgmr.msra.gmra.mrb[12].mxu1 %vm96_vm3, %v551_v59 }
 0xabf   :  { %v613_v61 = vpop.f32.mrb[12].mxu1 }
 0xac0   :  { %v620_v62 = vadd.f32 %v613_v61, %v1033_v50  ;;  %v840_v21 = vpop.f32.mrb[13].mxu1 }
 0xac1   :  { %v616_v63 = vpop.f32.mrb[14].mxu1 }
 0xac2   :  { %v621_v0 = vadd.f32 %v616_v63, %v1036_v53  ;;  %v841_v1 = vpop.f32.mrb[15].mxu1  ;;  %v626_v3 = vadd.f32 %v625_v60, %v620_v62 }
 0xac4   :  { %v628_v4 = vsel %vm141_vm4, %v626_v3, 0.0  ;;  %v627_v5 = vadd.f32 %v625_v60, %v621_v0 }
 0xac5   :  { %629 = vadd.xlane.f32.xlu1 %v628_v4 }
 0xac6   :  { %v631_v6 = vsel %vm141_vm4, %v627_v5, 0.0 }
 0xac9   :  { %632 = vadd.xlane.f32.xlu1 %v631_v6 }
 0xb52   :  { %v630_v7 = vpop.xlane.xlu1 %629 }
 0xb53   :  { %v634_v8 = vmul.f32 0.03125, %v630_v7 }
 0xb55   :  { %v636_v9 = vsub.f32 %v626_v3, %v634_v8 }
 0xb56   :  { %v633_v10 = vpop.xlane.xlu1 %632 }
 0xb57   :  { %v635_v11 = vmul.f32 0.03125, %v633_v10  ;;  %v638_v12 = vmul.f32 %v636_v9, %v636_v9 }
 0xb59   :  { %v637_v50 = vsub.f32 %v627_v5, %v635_v11  ;;  %v640_v13 = vsel %vm141_vm4, %v638_v12, 0.0 }
 0xb5a   :  { %641 = vadd.xlane.f32.xlu1 %v640_v13 }
 0xb5b   :  { %v639_v53 = vmul.f32 %v637_v50, %v637_v50 }
 0xb5d   :  { %v643_v14 = vsel %vm141_vm4, %v639_v53, 0.0 }
 0xb5e   :  { %644 = vadd.xlane.f32.xlu1 %v643_v14 }
 0xbe7   :  { %v642_v17 = vpop.xlane.xlu1 %641 }
 0xbe8   :  { %v646_v19 = vmul.f32 0.03125, %v642_v17 }
 0xbea   :  { %v648_v20 = vadd.f32 1e-05, %v646_v19 }
 0xbeb   :  { %v645_v22 = vpop.xlane.xlu1 %644 }
 0xbec   :  { %892 = vrsqrt.f32 %v648_v20  ;;  %v647_v23 = vmul.f32 0.03125, %v645_v22 }
 0xbee   :  { %v649_v24 = vadd.f32 1e-05, %v647_v23 }
 0xbf0   :  { %894 = vrsqrt.f32 %v649_v24 }
 0xbf6   :  { %v893_v26 = vpop.eup %892 }
 0xbf7   :  { %v652_v28 = vmul.f32 %v893_v26, %v636_v9 }
 0xbf9   :  { %v658_v30 = vmul.f32 %v657_v27, %v652_v28 }
 0xbfa   :  { %v895_v29 = vpop.eup %894 }
 0xbfb   :  { %v653_v31 = vmul.f32 %v895_v29, %v637_v50  ;;  %v664_v34 = vadd.f32 %v663_v32, %v658_v30 }
 0xbfd   :  { %v659_v33 = vmul.f32 %v657_v27, %v653_v31 }
 0xbff   :  { %v665_v35 = vadd.f32 %v663_v32, %v659_v33 }
 0xc01   :  { %v666_v36 = vpack.c.bf16 %v665_v35, %v664_v34 }
 0xc03   :  { %847 = vmatmul.mubr.msk.bf16.vlgmr.msra.gmra.mrb[12].mxu0 %vm141_vm4, %v666_v36 }
 0xcd6   :  { %v716_v37 = vpop.f32.mrb[12].mxu0 }
 0xcd7   :  { %723 = vst [vmem:[%s1109_s4] sm:$0xff] %v716_v37  ;;  %v848_v38 = vpop.f32.mrb[13].mxu0 }
 0xcd8   :  { %v719_v39 = vpop.f32.mrb[14].mxu0 }
 0xcd9   :  { %724 = vst [vmem:[%s1109_s4 + $0x8] sm:$0xff] %v719_v39  ;;  %v849_v43 = vpop.f32.mrb[15].mxu0 }

</bundles_post_ra>
